<compile_context>
chip_gen: v7x
topology: tpu7x:2x2x1
jax: 0.10.0
libtpu: 0.0.40
codegen_flags: <defaults>
</compile_context>

<pallas_src>
import functools

import jax
import jax.numpy as jnp
from jax.experimental import pallas as pl
from jax.experimental.pallas import tpu as pltpu

_LANE = 128
# Conservative double-buffered working-set budget: fits the default scoped
# VMEM on v5e (16 MiB) headroom-adjusted, and comfortably inside v6e/v7x.
_VMEM_BUDGET_BYTES = 12 * 1024 * 1024
_VMEM_LIMIT_BYTES = 32 * 1024 * 1024


def _modulation_kernel(dx_ref, tx_ref, wd_ref, bd_ref, wt_ref, bt_ref,
                       od_ref, ot_ref):
    # One grid step == one block of layers.  Weight refs are pre-transposed and
    # lane-concatenated: (D_in, L_BLK * D_out), so a single wide bf16 MXU
    # matmul produces every layer's output for this block at once.
    dx = dx_ref[...]                                     # (Nd, D)  bf16
    tx = tx_ref[...]                                     # (Nt, D)  bf16
    od = jnp.dot(dx, wd_ref[...], preferred_element_type=jnp.float32)
    ot = jnp.dot(tx, wt_ref[...], preferred_element_type=jnp.float32)
    od = od + bd_ref[...]                                # f32 epilogue
    ot = ot + bt_ref[...]
    od_ref[...] = od.astype(od_ref.dtype)
    ot_ref[...] = ot.astype(ot_ref.dtype)


def _choose_layer_block(num_layers, dim, tokens_hint=128,
                        budget_bytes=_VMEM_BUDGET_BYTES):
    """Largest layer block whose double-buffered working set fits the budget."""
    w_bytes = 2                                           # bf16 weights
    per_layer = 2 * (2 * dim * dim * w_bytes)             # 2 weight slabs, 2x buffered
    per_layer += 2 * (2 * tokens_hint * dim * 4)          # 2 f32 output blocks, 2x buffered
    per_layer += 2 * (2 * dim * 4)                        # 2 f32 bias rows, 2x buffered
    lblk = max(1, min(num_layers, budget_bytes // max(per_layer, 1)))
    if lblk < num_layers and (dim % _LANE) != 0:
        # Blocked streaming along the lane axis needs 128-aligned blocks.
        # TODO(synk): pad prompt_dim to a multiple of 128 to support blocked
        # streaming of very large, non-128-aligned layer stacks.
        lblk = num_layers
    return int(lblk)


@functools.partial(jax.jit, static_argnames=("layer_block",))
def _modulation_pallas(domain_prompt, task_prompt, wd_flat, bd_flat,
                       wt_flat, bt_flat, *, layer_block):
    n_d, dim = domain_prompt.shape
    n_t = task_prompt.shape[0]
    total_cols = wd_flat.shape[1]                         # padded_layers * dim
    blk_cols = layer_block * dim
    num_blocks = total_cols // blk_cols

    grid_spec = pltpu.PrefetchScalarGridSpec(
        num_scalar_prefetch=0,
        grid=(num_blocks,),
        in_specs=[
            pl.BlockSpec((n_d, dim), lambda l: (0, 0)),        # domain prompt (resident)
            pl.BlockSpec((n_t, dim), lambda l: (0, 0)),        # task prompt (resident)
            pl.BlockSpec((dim, blk_cols), lambda l: (0, l)),   # W_domain slab
            pl.BlockSpec((1, blk_cols), lambda l: (0, l)),     # b_domain row
            pl.BlockSpec((dim, blk_cols), lambda l: (0, l)),   # W_task slab
            pl.BlockSpec((1, blk_cols), lambda l: (0, l)),     # b_task row
        ],
        out_specs=[
            pl.BlockSpec((n_d, blk_cols), lambda l: (0, l)),
            pl.BlockSpec((n_t, blk_cols), lambda l: (0, l)),
        ],
    )

    out_d, out_t = pl.pallas_call(
        _modulation_kernel,
        out_shape=(
            jax.ShapeDtypeStruct((n_d, total_cols), jnp.float32),
            jax.ShapeDtypeStruct((n_t, total_cols), jnp.float32),
        ),
        grid_spec=grid_spec,
        compiler_params=pltpu.CompilerParams(
            dimension_semantics=("parallel",),
            vmem_limit_bytes=_VMEM_LIMIT_BYTES,
        ),
    )(domain_prompt, task_prompt, wd_flat, bd_flat, wt_flat, bt_flat)
    return out_d, out_t


class SeparateModulationNetwork:
    """JAX/Pallas re-implementation of the PyTorch module."""

    def __init__(self, prompt_dim, num_layers, key):
        self.prompt_dim = prompt_dim
        self.num_layers = num_layers
        k = jax.random.split(key, 4)
        bound = 1.0 / (prompt_dim ** 0.5)    # PyTorch nn.Linear default init range
        # PyTorch nn.Linear convention: W is (out_features, in_features).
        wd = jax.random.uniform(k[0], (num_layers, prompt_dim, prompt_dim),
                                jnp.float32, -bound, bound)
        bd = jax.random.uniform(k[1], (num_layers, prompt_dim),
                                jnp.float32, -bound, bound)
        wt = jax.random.uniform(k[2], (num_layers, prompt_dim, prompt_dim),
                                jnp.float32, -bound, bound)
        bt = jax.random.uniform(k[3], (num_layers, prompt_dim),
                                jnp.float32, -bound, bound)

        # Keep weights in bf16 (kernel streams them from HBM; halves bytes).
        # Biases stay f32 (tiny; epilogue runs in f32 -- no bf16 VPU needed,
        # important for v5e).
        self.wd = wd.astype(jnp.bfloat16)
        self.wt = wt.astype(jnp.bfloat16)
        self.bd = bd
        self.bt = bt

        # One-time layout transform for the kernel:
        #   W (L, out, in) -> (in, L*out)   (pre-transposed, lane-concatenated)
        #   b (L, out)     -> (1, L*out)
        # plus zero-padding of the layer axis up to a multiple of the block.
        self.layer_block = _choose_layer_block(num_layers, prompt_dim)
        padded_layers = pl.cdiv(num_layers, self.layer_block) * self.layer_block
        pad_cols = (padded_layers - num_layers) * prompt_dim

        def _flatten(w, b):
            w_t = jnp.transpose(w, (2, 0, 1)).reshape(
                prompt_dim, num_layers * prompt_dim)
            b_f = b.reshape(1, num_layers * prompt_dim).astype(jnp.float32)
            if pad_cols:
                w_t = jnp.pad(w_t, ((0, 0), (0, pad_cols)))
                b_f = jnp.pad(b_f, ((0, 0), (0, pad_cols)))
            return w_t, b_f

        self._wd_flat, self._bd_flat = _flatten(self.wd, self.bd)
        self._wt_flat, self._bt_flat = _flatten(self.wt, self.bt)

    def __call__(self, domain_prompt, task_prompt):
        dp = domain_prompt.astype(jnp.bfloat16)
        tp = task_prompt.astype(jnp.bfloat16)
        out_d, out_t = _modulation_pallas(
            dp, tp, self._wd_flat, self._bd_flat, self._wt_flat, self._bt_flat,
            layer_block=self.layer_block)
        # Match the PyTorch forward: pair of python lists of per-layer tensors.
        D = self.prompt_dim
        modulated_domain_prompts = [out_d[:, l * D:(l + 1) * D]
                                    for l in range(self.num_layers)]
        modulated_task_prompts = [out_t[:, l * D:(l + 1) * D]
                                  for l in range(self.num_layers)]
        return modulated_domain_prompts, modulated_task_prompts


def _reference(domain_prompt, task_prompt, wd, bd, wt, bt):
    # Same bf16 operand / f32-accumulate numerics as the kernel.
    dp = domain_prompt.astype(jnp.bfloat16)
    tp = task_prompt.astype(jnp.bfloat16)
    out_d = jnp.einsum('nd,lod->lno', dp, wd,
                       preferred_element_type=jnp.float32) + bd[:, None, :]
    out_t = jnp.einsum('nd,lod->lno', tp, wt,
                       preferred_element_type=jnp.float32) + bt[:, None, :]
    return out_d, out_t


if __name__ == "__main__":
    prompt_dim = 128          # lane-aligned prompt dimension
    num_layers = 3
    n_domain_tokens = 8
    n_task_tokens = 8

    key = jax.random.PRNGKey(0)
    k_dp, k_tp, k_params = jax.random.split(key, 3)

    domain_prompt = jax.random.normal(k_dp, (n_domain_tokens, prompt_dim),
                                      jnp.float32)
    task_prompt = jax.random.normal(k_tp, (n_task_tokens, prompt_dim),
                                    jnp.float32)

    net = SeparateModulationNetwork(prompt_dim, num_layers, k_params)
    mod_domain, mod_task = net(domain_prompt, task_prompt)
    jax.block_until_ready(mod_domain)
    jax.block_until_ready(mod_task)

    # Correctness check against a plain-JAX reference with identical numerics.
    ref_d, ref_t = _reference(domain_prompt, task_prompt,
                              net.wd, net.bd, net.wt, net.bt)
    for l in range(num_layers):
        assert jnp.allclose(mod_domain[l], ref_d[l], atol=1e-3, rtol=1e-3)
        assert jnp.allclose(mod_task[l], ref_t[l], atol=1e-3, rtol=1e-3)

    print("KERNEL_OK")
</pallas_src>

<mosaic_0001>
module attributes {stable_mosaic.version = 11 : i64} {
  func.func @_modulation_kernel(%arg0: i32, %arg1: memref<8x128xbf16, #tpu.memory_space<vmem>>, %arg2: memref<8x128xbf16, #tpu.memory_space<vmem>>, %arg3: memref<128x384xbf16, #tpu.memory_space<vmem>>, %arg4: memref<1x384xf32, #tpu.memory_space<vmem>>, %arg5: memref<128x384xbf16, #tpu.memory_space<vmem>>, %arg6: memref<1x384xf32, #tpu.memory_space<vmem>>, %arg7: memref<8x384xf32, #tpu.memory_space<vmem>>, %arg8: memref<8x384xf32, #tpu.memory_space<vmem>>) attributes {dimension_semantics = [#tpu.dimension_semantics<parallel>], iteration_bounds = array<i64: 1>, scalar_prefetch = 0 : i64, scratch_operands = 0 : i64, tpu.core_type = #tpu.core_type<tc>, window_params = [{pipeline_mode = #tpu.pipeline_mode<synchronous>, transform_indices = @transform_0, window_bounds = array<i64: 8, 128>}, {pipeline_mode = #tpu.pipeline_mode<synchronous>, transform_indices = @transform_1, window_bounds = array<i64: 8, 128>}, {transform_indices = @transform_2, window_bounds = array<i64: 128, 384>}, {transform_indices = @transform_3, window_bounds = array<i64: 1, 384>}, {transform_indices = @transform_4, window_bounds = array<i64: 128, 384>}, {transform_indices = @transform_5, window_bounds = array<i64: 1, 384>}, {transform_indices = @transform_6, window_bounds = array<i64: 8, 384>}, {transform_indices = @transform_7, window_bounds = array<i64: 8, 384>}]} {
    %c0 = arith.constant 0 : index
    %c0_0 = arith.constant 0 : index
    %0 = vector.load %arg1[%c0, %c0_0] : memref<8x128xbf16, #tpu.memory_space<vmem>>, vector<8x128xbf16>
    %c0_1 = arith.constant 0 : index
    %c0_2 = arith.constant 0 : index
    %1 = vector.load %arg2[%c0_1, %c0_2] : memref<8x128xbf16, #tpu.memory_space<vmem>>, vector<8x128xbf16>
    %c0_3 = arith.constant 0 : index
    %c0_4 = arith.constant 0 : index
    %2 = vector.load %arg3[%c0_3, %c0_4] : memref<128x384xbf16, #tpu.memory_space<vmem>>, vector<128x384xbf16>
    %cst = arith.constant dense<0.000000e+00> : vector<8x384xf32>
    %3 = tpu.matmul %0, %2, %cst {dimension_numbers = #tpu.dot_dimension_numbers<[1], [0], [0], [1], [0, 0, 1, 1], [], []>} : vector<8x128xbf16>, vector<128x384xbf16>, vector<8x384xf32> -> vector<8x384xf32>
    %c0_5 = arith.constant 0 : index
    %c0_6 = arith.constant 0 : index
    %4 = vector.load %arg5[%c0_5, %c0_6] : memref<128x384xbf16, #tpu.memory_space<vmem>>, vector<128x384xbf16>
    %cst_7 = arith.constant dense<0.000000e+00> : vector<8x384xf32>
    %5 = tpu.matmul %1, %4, %cst_7 {dimension_numbers = #tpu.dot_dimension_numbers<[1], [0], [0], [1], [0, 0, 1, 1], [], []>} : vector<8x128xbf16>, vector<128x384xbf16>, vector<8x384xf32> -> vector<8x384xf32>
    %c0_8 = arith.constant 0 : index
    %c0_9 = arith.constant 0 : index
    %6 = vector.load %arg4[%c0_8, %c0_9] : memref<1x384xf32, #tpu.memory_space<vmem>>, vector<1x384xf32>
    %7 = vector.broadcast %6 : vector<1x384xf32> to vector<8x384xf32>
    %8 = arith.addf %3, %7 : vector<8x384xf32>
    %c0_10 = arith.constant 0 : index
    %c0_11 = arith.constant 0 : index
    %9 = vector.load %arg6[%c0_10, %c0_11] : memref<1x384xf32, #tpu.memory_space<vmem>>, vector<1x384xf32>
    %10 = vector.broadcast %9 : vector<1x384xf32> to vector<8x384xf32>
    %11 = arith.addf %5, %10 : vector<8x384xf32>
    %c0_12 = arith.constant 0 : index
    %c0_13 = arith.constant 0 : index
    %12 = vector.load %arg7[%c0_12, %c0_13] : memref<8x384xf32, #tpu.memory_space<vmem>>, vector<8x384xf32>
    tpu.vector_store %arg7[%c0_12, %c0_13], %8 {strides = array<i32>} : memref<8x384xf32, #tpu.memory_space<vmem>>, vector<8x384xf32>,
    %c0_14 = arith.constant 0 : index
    %c0_15 = arith.constant 0 : index
    %13 = vector.load %arg8[%c0_14, %c0_15] : memref<8x384xf32, #tpu.memory_space<vmem>>, vector<8x384xf32>
    tpu.vector_store %arg8[%c0_14, %c0_15], %11 {strides = array<i32>} : memref<8x384xf32, #tpu.memory_space<vmem>>, vector<8x384xf32>,
    return
  }
  func.func @transform_0(%arg0: i32) -> (i32, i32) {
    %c0_i32 = arith.constant 0 : i32
    %c0_i32_0 = arith.constant 0 : i32
    %c0_i32_1 = arith.constant 0 : i32
    return %c0_i32, %c0_i32_0 : i32, i32
  }
  func.func @transform_1(%arg0: i32) -> (i32, i32) {
    %c0_i32 = arith.constant 0 : i32
    %c0_i32_0 = arith.constant 0 : i32
    %c0_i32_1 = arith.constant 0 : i32
    return %c0_i32, %c0_i32_0 : i32, i32
  }
  func.func @transform_2(%arg0: i32) -> (i32, i32) {
    %c0_i32 = arith.constant 0 : i32
    %c0_i32_0 = arith.constant 0 : i32
    return %c0_i32, %arg0 : i32, i32
  }
  func.func @transform_3(%arg0: i32) -> (i32, i32) {
    %c0_i32 = arith.constant 0 : i32
    %c0_i32_0 = arith.constant 0 : i32
    return %c0_i32, %arg0 : i32, i32
  }
  func.func @transform_4(%arg0: i32) -> (i32, i32) {
    %c0_i32 = arith.constant 0 : i32
    %c0_i32_0 = arith.constant 0 : i32
    return %c0_i32, %arg0 : i32, i32
  }
  func.func @transform_5(%arg0: i32) -> (i32, i32) {
    %c0_i32 = arith.constant 0 : i32
    %c0_i32_0 = arith.constant 0 : i32
    return %c0_i32, %arg0 : i32, i32
  }
  func.func @transform_6(%arg0: i32) -> (i32, i32) {
    %c0_i32 = arith.constant 0 : i32
    %c0_i32_0 = arith.constant 0 : i32
    return %c0_i32, %arg0 : i32, i32
  }
  func.func @transform_7(%arg0: i32) -> (i32, i32) {
    %c0_i32 = arith.constant 0 : i32
    %c0_i32_0 = arith.constant 0 : i32
    return %c0_i32, %arg0 : i32, i32
  }
}

</mosaic_0001>

<bundles_post_ra>
// kernel: _modulation_pallas.1
= control target key start
LH: loop header
LB: loop body
LE: loop exit
PB: predicated region body
PF: predicated region fallthrough
CT: control target
= control target key end

     0   :  { %13 = vsyncpa [#allocation3], 0  ;;  %s1108_s0 = inlined_call_operand.hbm [shape: bf16[8,128], index: 0, kind: input, shape index: {}]   ;;  %s1109_s1 = inlined_call_operand.hbm [shape: bf16[8,128], index: 1, kind: input, shape index: {}]   ;;  %s1110_s2 = inlined_call_operand.hbm [shape: bf16[128,384], index: 2, kind: input, shape index: {}]   ;;  %s1111_s3 = inlined_call_operand.vmem [shape: f32[1,384], index: 3, kind: input, shape index: {}]   ;;  %s1112_s4 = inlined_call_operand.hbm [shape: bf16[128,384], index: 4, kind: input, shape index: {}]   ;;  %s1113_s5 = inlined_call_operand.vmem [shape: f32[1,384], index: 5, kind: input, shape index: {}]   ;;  %s1114_s6 = inlined_call_operand.hbm [shape: f32[8,384], index: 6, kind: output, shape index: {0}]   ;;  %s1115_s7 = inlined_call_operand.hbm [shape: f32[8,384], index: 7, kind: output, shape index: {1}]  }
   0x1   :  { %14 = vsyncpa [#allocation6], 0 }
   0x2   :  { %15 = vsyncpa [#allocation9], 0 }
   0x3   :  { %16 = vsyncpa [#allocation4], 0 }
   0x4   :  { %17 = vsyncpa [#allocation12], 0  ;;  %s957_s24 = smov [#allocation5]   ;;  %s958_s26 = smov [#allocation2]  }
   0x5   :  { %s34_s25 = sshll.u32 %s957_s24, 4  ;;  %s24_s27 = sshll.u32 %s958_s26, 4  ;;  %s35_s25 = int_to_ptr.vmem [resolvable:$true] %s34_s25  ;;  %s25_s27 = int_to_ptr.vmem [resolvable:$true] %s24_s27 }
   0x6   :  { %s815_s30 = scalar_lea.hbm %s1109_s1, 64 }
   0x7   :  { %p816_p0 = scmp.ne.s32.totalorder %s1109_s1, %s815_s30  ;;  %p819_p1 = scmp.lt.u32.totalorder %s815_s30, %s1109_s1 }
   0x9   :  { %p821_p2 = pnand %p819_p1, %p816_p0 }
   0xb   :  { %824 = shalt.err (!%p821_p2)
}
   0xc   :  { %s825_s12 = scalar_lea.vmem %s35_s25, 64  ;;  %p830_p4 = scmp.lt.s32.totalorder %s35_s25, %s35_s25 }
   0xd   :  { %p826_p3 = scmp.ne.s32.totalorder %s35_s25, %s825_s12  ;;  %p831_p5 = scmp.lt.s32.totalorder %s825_s12, %s825_s12 }
   0xf   :  { %p832_p6 = por %p831_p5, %p830_p4 }
  0x11   :  { %p833_p7 = pnand %p832_p6, %p826_p3 }
  0x13   :  { %836 = shalt.err (!%p833_p7)
}
  0x14   :  { %37 = dma.hbm_to_vmem [thread:$0]  %s1109_s1, 64, %s35_s25, [#allocation6]  }
  0x15   :  { %s837_s17 = scalar_lea.hbm %s1108_s0, 64 }
  0x16   :  { %p838_p8 = scmp.ne.s32.totalorder %s1108_s0, %s837_s17  ;;  %p841_p9 = scmp.lt.u32.totalorder %s837_s17, %s1108_s0 }
  0x18   :  { %p843_p10 = pnand %p841_p9, %p838_p8 }
  0x1a   :  { %846 = shalt.err (!%p843_p10)
}
  0x1b   :  { %s847_s22 = scalar_lea.vmem %s25_s27, 64  ;;  %p852_p12 = scmp.lt.s32.totalorder %s25_s27, %s25_s27 }
  0x1c   :  { %p848_p11 = scmp.ne.s32.totalorder %s25_s27, %s847_s22  ;;  %p853_p13 = scmp.lt.s32.totalorder %s847_s22, %s847_s22 }
  0x1e   :  { %p854_p0 = por %p853_p13, %p852_p12 }
  0x20   :  { %p855_p1 = pnand %p854_p0, %p848_p11 }
  0x22   :  { %858 = shalt.err (!%p855_p1)
}
  0x23   :  { %27 = dma.hbm_to_vmem [thread:$0]  %s1108_s0, 64, %s25_s27, [#allocation3]  }
  0x24   :  { %s959_s24 = smov [#allocation7]   ;;  %s859_s29 = scalar_lea.hbm %s1110_s2, 3072 }
  0x25   :  { %s43_s25 = sshll.u32 %s959_s24, 4  ;;  %p860_p2 = scmp.ne.s32.totalorder %s1110_s2, %s859_s29  ;;  %s44_s25 = int_to_ptr.vmem [resolvable:$true] %s43_s25 }
  0x26   :  { %p863_p3 = scmp.lt.u32.totalorder %s859_s29, %s1110_s2 }
  0x28   :  { %p865_p4 = pnand %p863_p3, %p860_p2 }
  0x2a   :  { %868 = shalt.err (!%p865_p4)
}
  0x2b   :  { %s869_s11 = scalar_lea.vmem %s44_s25, 3072  ;;  %p874_p6 = scmp.lt.s32.totalorder %s44_s25, %s44_s25 }
  0x2c   :  { %p870_p5 = scmp.ne.s32.totalorder %s44_s25, %s869_s11  ;;  %p875_p7 = scmp.lt.s32.totalorder %s869_s11, %s869_s11 }
  0x2e   :  { %p876_p8 = por %p875_p7, %p874_p6 }
  0x30   :  { %p877_p9 = pnand %p876_p8, %p870_p5 }
  0x32   :  { %880 = shalt.err (!%p877_p9)
}
  0x33   :  { %s960_s0 = smov 192   ;;  %s961_s27 = smov 12  }
  0x34   :  { %49 = dma.hbm_to_vmem [thread:$0]  %s1110_s2, 3072, %s44_s25, [#allocation6], %s960_s0, %s960_s0, %s961_s27  }
  0x35   :  { %s962_s14 = smov [#allocation8]   ;;  %s881_s18 = scalar_lea.hbm %s1112_s4, 3072 }
  0x36   :  { %s57_s15 = sshll.u32 %s962_s14, 4  ;;  %p882_p10 = scmp.ne.s32.totalorder %s1112_s4, %s881_s18  ;;  %s58_s15 = int_to_ptr.vmem [resolvable:$true] %s57_s15 }
  0x37   :  { %p885_p11 = scmp.lt.u32.totalorder %s881_s18, %s1112_s4 }
  0x39   :  { %p887_p12 = pnand %p885_p11, %p882_p10 }
  0x3b   :  { %890 = shalt.err (!%p887_p12)
}
  0x3c   :  { %s891_s1 = scalar_lea.vmem %s58_s15, 3072  ;;  %p896_p0 = scmp.lt.s32.totalorder %s58_s15, %s58_s15 }
  0x3d   :  { %p892_p13 = scmp.ne.s32.totalorder %s58_s15, %s891_s1  ;;  %p897_p1 = scmp.lt.s32.totalorder %s891_s1, %s891_s1 }
  0x3f   :  { %p898_p2 = por %p897_p1, %p896_p0 }
  0x41   :  { %p899_p3 = pnand %p898_p2, %p892_p13 }
  0x43   :  { %902 = shalt.err (!%p899_p3)
}
  0x44   :  { %63 = dma.hbm_to_vmem [thread:$0]  %s1112_s4, 3072, %s58_s15, [#allocation9], %s960_s0, %s960_s0, %s961_s27  }
  0x45   :  { %947 = dma.done.wait [#allocation3], 64  }
  0x46   :  { %948 = vsyncadd [#allocation3], 4294967232 }
  0x47   :  { %949 = dma.done.wait [#allocation6], 3136  }
  0x48   :  { %950 = vsyncadd [#allocation6], 4294964160 }
  0x49   :  { %951 = dma.done.wait [#allocation9], 3072  }
  0x4a   :  { %952 = vsyncadd [#allocation9], 4294964224  ;;  %v963_v0 = vmov 0.0   ;;  %vm964_vm0 = vmmov 0   ;;  %v965_v1 = vmov 0   ;;  %v147_v52 = vlaneseq  ;;  %s966_s25 = smov [#allocation10]  }
  0x4b   :  { %700 = vmatprep.subr.bf16.mxu1 %v963_v0  ;;  %716 = vmatprep.mubr.msk.bf16.mxu1 %vm964_vm0, %v963_v0  ;;  %v751_v2 = vld [vmem:[#allocation7 + $0x4] ss:$12 sps:$4 sm:$0xff]   ;;  %v753_v3 = vld [vmem:[#allocation7 + $0x8] ss:$12 sps:$4 sm:$0xff]   ;;  %v754_v4 = vld [vmem:[#allocation7] ss:$12 sps:$4 sm:$0xff]  }
  0x4c   :  { %322 = vmatprep.mubr.bf16.mxu0 %v965_v1  ;;  %290 = vmatprep.subr.bf16.mxu0 %v751_v2  ;;  %v755_v5 = vld [vmem:[#allocation7 + $0x1c] ss:$12 sps:$4 sm:$0xff]   ;;  %v757_v6 = vld [vmem:[#allocation7 + $0x20] ss:$12 sps:$4 sm:$0xff]   ;;  %v758_v7 = vld [vmem:[#allocation7 + $0x18] ss:$12 sps:$4 sm:$0xff]  }
  0x4d   :  { %701 = vmatpush3.bf16.msra.mxu1 %v753_v3  ;;  %291 = vmatpush1.bf16.msra.mxu0 %v754_v4  ;;  %v759_v8 = vld [vmem:[#allocation7 + $0x34] ss:$12 sps:$4 sm:$0xff]   ;;  %v761_v9 = vld [vmem:[#allocation7 + $0x38] ss:$12 sps:$4 sm:$0xff]   ;;  %v762_v10 = vld [vmem:[#allocation7 + $0x30] ss:$12 sps:$4 sm:$0xff]  }
  0x4e   :  { %702 = vmatprep.subr.bf16.mxu1 %v963_v0  ;;  %292 = vmatprep.subr.bf16.mxu0 %v755_v5  ;;  %v763_v11 = vld [vmem:[#allocation7 + $0x4c] ss:$12 sps:$4 sm:$0xff]   ;;  %v765_v12 = vld [vmem:[#allocation7 + $0x50] ss:$12 sps:$4 sm:$0xff]   ;;  %v766_v13 = vld [vmem:[#allocation7 + $0x48] ss:$12 sps:$4 sm:$0xff]  }
  0x4f   :  { %v767_v14 = vld [vmem:[#allocation7 + $0x64] ss:$12 sps:$4 sm:$0xff]   ;;  %v769_v15 = vld [vmem:[#allocation7 + $0x68] ss:$12 sps:$4 sm:$0xff]   ;;  %v770_v16 = vld [vmem:[#allocation7 + $0x60] ss:$12 sps:$4 sm:$0xff]  }
  0x50   :  { %v771_v17 = vld [vmem:[#allocation7 + $0x7c] ss:$12 sps:$4 sm:$0xff]   ;;  %v773_v18 = vld [vmem:[#allocation7 + $0x80] ss:$12 sps:$4 sm:$0xff]   ;;  %v774_v19 = vld [vmem:[#allocation7 + $0x78] ss:$12 sps:$4 sm:$0xff]  }
  0x51   :  { %703 = vmatpush3.bf16.msra.mxu1 %v757_v6  ;;  %293 = vmatpush1.bf16.msra.mxu0 %v758_v7  ;;  %v775_v20 = vld [vmem:[#allocation7 + $0x94] ss:$12 sps:$4 sm:$0xff]   ;;  %v777_v21 = vld [vmem:[#allocation7 + $0x98] ss:$12 sps:$4 sm:$0xff]   ;;  %v778_v22 = vld [vmem:[#allocation7 + $0x90] ss:$12 sps:$4 sm:$0xff]  }
  0x52   :  { %704 = vmatprep.subr.bf16.mxu1 %v963_v0  ;;  %294 = vmatprep.subr.bf16.mxu0 %v759_v8  ;;  %v779_v23 = vld [vmem:[#allocation7 + $0xac] ss:$12 sps:$4 sm:$0xff]   ;;  %v781_v24 = vld [vmem:[#allocation7 + $0xb0] ss:$12 sps:$4 sm:$0xff]   ;;  %v782_v25 = vld [vmem:[#allocation7 + $0xa8] ss:$12 sps:$4 sm:$0xff]  }
  0x53   :  { %v785_v26 = vld [vmem:[#allocation8 + $0x4] ss:$12 sps:$4 sm:$0xff]   ;;  %v79_v27 = vld [vmem:[#allocation2] sm:$0xf]  ;;  %v786_v28 = vld [vmem:[#allocation8 + $0x8] ss:$12 sps:$4 sm:$0xff]  }
  0x54   :  { %v783_v29 = vld [vmem:[#allocation8] ss:$12 sps:$4 sm:$0xff]   ;;  %v789_v30 = vld [vmem:[#allocation8 + $0x1c] ss:$12 sps:$4 sm:$0xff]   ;;  %v787_v32 = vld [vmem:[#allocation8 + $0x18] ss:$12 sps:$4 sm:$0xff]  }
  0x55   :  { %705 = vmatpush3.bf16.msra.mxu1 %v761_v9  ;;  %295 = vmatpush1.bf16.msra.mxu0 %v762_v10  ;;  %v790_v31 = vld [vmem:[#allocation8 + $0x20] ss:$12 sps:$4 sm:$0xff]   ;;  %v794_v34 = vld [vmem:[#allocation8 + $0x38] ss:$12 sps:$4 sm:$0xff]   ;;  %v791_v35 = vld [vmem:[#allocation8 + $0x30] ss:$12 sps:$4 sm:$0xff]  }
  0x56   :  { %706 = vmatprep.subr.bf16.mxu1 %v963_v0  ;;  %296 = vmatprep.subr.bf16.mxu0 %v763_v11  ;;  %v793_v33 = vld [vmem:[#allocation8 + $0x34] ss:$12 sps:$4 sm:$0xff]   ;;  %v797_v36 = vld [vmem:[#allocation8 + $0x4c] ss:$12 sps:$4 sm:$0xff]   ;;  %v798_v37 = vld [vmem:[#allocation8 + $0x50] ss:$12 sps:$4 sm:$0xff]  }
  0x57   :  { %v795_v38 = vld [vmem:[#allocation8 + $0x48] ss:$12 sps:$4 sm:$0xff]   ;;  %v801_v39 = vld [vmem:[#allocation8 + $0x64] ss:$12 sps:$4 sm:$0xff]   ;;  %v799_v41 = vld [vmem:[#allocation8 + $0x60] ss:$12 sps:$4 sm:$0xff]  }
  0x58   :  { %v802_v40 = vld [vmem:[#allocation8 + $0x68] ss:$12 sps:$4 sm:$0xff]   ;;  %v806_v43 = vld [vmem:[#allocation8 + $0x80] ss:$12 sps:$4 sm:$0xff]   ;;  %v803_v44 = vld [vmem:[#allocation8 + $0x78] ss:$12 sps:$4 sm:$0xff]  }
  0x59   :  { %707 = vmatpush3.bf16.msra.mxu1 %v765_v12  ;;  %297 = vmatpush1.bf16.msra.mxu0 %v766_v13  ;;  %v805_v42 = vld [vmem:[#allocation8 + $0x7c] ss:$12 sps:$4 sm:$0xff]   ;;  %v809_v45 = vld [vmem:[#allocation8 + $0x94] ss:$12 sps:$4 sm:$0xff]   ;;  %v810_v46 = vld [vmem:[#allocation8 + $0x98] ss:$12 sps:$4 sm:$0xff]  }
  0x5a   :  { %708 = vmatprep.subr.bf16.mxu1 %v963_v0  ;;  %298 = vmatprep.subr.bf16.mxu0 %v767_v14  ;;  %v807_v47 = vld [vmem:[#allocation8 + $0x90] ss:$12 sps:$4 sm:$0xff]   ;;  %v813_v48 = vld [vmem:[#allocation8 + $0xac] ss:$12 sps:$4 sm:$0xff]   ;;  %v811_v50 = vld [vmem:[#allocation8 + $0xa8] ss:$12 sps:$4 sm:$0xff]  }
  0x5b   :  { %v814_v49 = vld [vmem:[#allocation8 + $0xb0] ss:$12 sps:$4 sm:$0xff]   ;;  %v148_v53 = vshrl.u32 %v147_v52, 7  ;;  %v145_v55 = vld [vmem:[%s1111_s3] sm:$0x7]  ;;  %s609_s26 = sshll.u32 %s966_s25, 4  ;;  %s610_s26 = int_to_ptr.vmem [resolvable:$true] %s609_s26 }
  0x5c   :  { %v80_v51 = vld [vmem:[#allocation5] sm:$0xf]  ;;  %s903_s3 = scalar_lea.vmem %s610_s26, 384  ;;  %p908_p5 = scmp.lt.s32.totalorder %s610_s26, %s610_s26 }
  0x5d   :  { %709 = vmatpush3.bf16.msra.mxu1 %v769_v15  ;;  %299 = vmatpush1.bf16.msra.mxu0 %v770_v16  ;;  %v157_v54 = vsub.s32 2, %v148_v53  ;;  %v149_v56 = vsub.s32 0, %v148_v53  ;;  %v153_v57 = vsub.s32 1, %v148_v53  ;;  %p904_p4 = scmp.ne.s32.totalorder %s610_s26, %s903_s3  ;;  %p909_p6 = scmp.lt.s32.totalorder %s903_s3, %s903_s3 }
  0x5e   :  { %710 = vmatprep.subr.bf16.mxu1 %v963_v0  ;;  %300 = vmatprep.subr.bf16.mxu0 %v771_v17 }
  0x5f   :  { %v158_v58 = vrot.slane %v145_v55, %v157_v54  ;;  %v150_v59 = vrot.slane %v145_v55, %v149_v56  ;;  %v154_v60 = vrot.slane %v145_v55, %v153_v57  ;;  %p910_p7 = por %p909_p6, %p908_p5 }
  0x61   :  { %711 = vmatpush3.bf16.msra.mxu1 %v773_v18  ;;  %301 = vmatpush1.bf16.msra.mxu0 %v774_v19  ;;  %p911_p8 = pnand %p910_p7, %p904_p4 }
  0x62   :  { %712 = vmatprep.subr.bf16.mxu1 %v963_v0  ;;  %302 = vmatprep.subr.bf16.mxu0 %v775_v20 }
  0x65   :  { %713 = vmatpush3.bf16.msra.mxu1 %v777_v21  ;;  %303 = vmatpush1.bf16.msra.mxu0 %v778_v22 }
  0x66   :  { %714 = vmatprep.subr.bf16.mxu1 %v963_v0  ;;  %304 = vmatprep.subr.bf16.mxu0 %v779_v23 }
  0x69   :  { %715 = vmatpush3.bf16.msra.mxu1 %v781_v24  ;;  %305 = vmatpush1.bf16.msra.mxu0 %v782_v25 }
  0x6a   :  { %720 = vmatprep.subr.bf16.mxu1 %v963_v0  ;;  %516 = vmatprep.subr.bf16.mxu0 %v785_v26 }
  0x6c   :  { %717 = vmatmul.mubr.bf16.vlgmr.msra.gmra.mrb[0].mxu1 %v79_v27  ;;  %323 = vmatmul.mubr.bf16.vlgmr.msra.gmra.mrb[0].mxu0 %v79_v27 }
  0x6d   :  { %721 = vmatpush3.bf16.msra.mxu1 %v786_v28  ;;  %517 = vmatpush1.bf16.msra.mxu0 %v783_v29 }
  0x6e   :  { %722 = vmatprep.subr.bf16.mxu1 %v963_v0  ;;  %518 = vmatprep.subr.bf16.mxu0 %v789_v30 }
  0x6f   :  { %736 = vmatprep.mubr.msk.bf16.mxu1 %vm964_vm0, %v963_v0  ;;  %548 = vmatprep.mubr.bf16.mxu0 %v965_v1 }
  0x71   :  { %723 = vmatpush3.bf16.msra.mxu1 %v790_v31  ;;  %519 = vmatpush1.bf16.msra.mxu0 %v787_v32 }
  0x72   :  { %724 = vmatprep.subr.bf16.mxu1 %v963_v0  ;;  %520 = vmatprep.subr.bf16.mxu0 %v793_v33 }
  0x75   :  { %725 = vmatpush3.bf16.msra.mxu1 %v794_v34  ;;  %521 = vmatpush1.bf16.msra.mxu0 %v791_v35 }
  0x76   :  { %726 = vmatprep.subr.bf16.mxu1 %v963_v0  ;;  %522 = vmatprep.subr.bf16.mxu0 %v797_v36 }
  0x79   :  { %727 = vmatpush3.bf16.msra.mxu1 %v798_v37  ;;  %523 = vmatpush1.bf16.msra.mxu0 %v795_v38 }
  0x7a   :  { %728 = vmatprep.subr.bf16.mxu1 %v963_v0  ;;  %524 = vmatprep.subr.bf16.mxu0 %v801_v39 }
  0x7d   :  { %729 = vmatpush3.bf16.msra.mxu1 %v802_v40  ;;  %525 = vmatpush1.bf16.msra.mxu0 %v799_v41 }
  0x7e   :  { %730 = vmatprep.subr.bf16.mxu1 %v963_v0  ;;  %526 = vmatprep.subr.bf16.mxu0 %v805_v42 }
  0x81   :  { %731 = vmatpush3.bf16.msra.mxu1 %v806_v43  ;;  %527 = vmatpush1.bf16.msra.mxu0 %v803_v44 }
  0x82   :  { %732 = vmatprep.subr.bf16.mxu1 %v963_v0  ;;  %528 = vmatprep.subr.bf16.mxu0 %v809_v45 }
  0x85   :  { %733 = vmatpush3.bf16.msra.mxu1 %v810_v46  ;;  %529 = vmatpush1.bf16.msra.mxu0 %v807_v47 }
  0x86   :  { %734 = vmatprep.subr.bf16.mxu1 %v963_v0  ;;  %530 = vmatprep.subr.bf16.mxu0 %v813_v48 }
  0x89   :  { %735 = vmatpush3.bf16.msra.mxu1 %v814_v49  ;;  %531 = vmatpush1.bf16.msra.mxu0 %v811_v50 }
  0x8c   :  { %737 = vmatmul.mubr.bf16.vlgmr.msra.gmra.mrb[4].mxu1 %v80_v51  ;;  %549 = vmatmul.mubr.bf16.vlgmr.msra.gmra.mrb[4].mxu0 %v80_v51 }
 0x13f   :  { %v365_v61 = vpop.f32.mrb[0].mxu1  ;;  %v324_v63 = vpop.f32.mrb[0].mxu0 }
 0x140   :  { %v366_v62 = vadd.f32 %v365_v61, %v158_v58  ;;  %v718_v0 = vpop.f32.mrb[1].mxu1  ;;  %v325_v1 = vadd.f32 %v324_v63, %v150_v59  ;;  %v326_v2 = vpop.f32.mrb[1].mxu0 }
 0x141   :  { %v368_v3 = vpop.f32.mrb[2].mxu1  ;;  %v327_v4 = vadd.f32 %v326_v2, %v154_v60  ;;  %v328_v5 = vpop.f32.mrb[2].mxu0 }
 0x142   :  { %599 = vst [vmem:[#allocation10 + $0x10] sm:$0xff] %v366_v62  ;;  %v719_v6 = vpop.f32.mrb[3].mxu1  ;;  %597 = vst [vmem:[#allocation10] sm:$0xff] %v325_v1  ;;  %v329_v7 = vpop.f32.mrb[3].mxu0 }
 0x143   :  { %598 = vst [vmem:[#allocation10 + $0x8] sm:$0xff] %v327_v4 }
 0x144   :  { %914 = shalt.err (!%p911_p8)
}
 0x145   :  { %s915_s30 = scalar_lea.hbm %s1114_s6, 384 }
 0x146   :  { %p916_p9 = scmp.ne.s32.totalorder %s1114_s6, %s915_s30  ;;  %p919_p10 = scmp.lt.u32.totalorder %s915_s30, %s1114_s6 }
 0x148   :  { %p921_p11 = pnand %p919_p10, %p916_p9 }
 0x14a   :  { %924 = shalt.err (!%p921_p11)
}
 0x14b   :  { %612 = dma.vmem_to_hbm [thread:$0]  %s610_s26, 384, %s1114_s6, [#allocation4]   ;;  %v371_v8 = vld [vmem:[%s1113_s5] sm:$0x7] }
 0x14c   :  { %v384_v9 = vrot.slane %v371_v8, %v157_v54  ;;  %v376_v10 = vrot.slane %v371_v8, %v149_v56  ;;  %v380_v11 = vrot.slane %v371_v8, %v153_v57  ;;  %s967_s14 = smov [#allocation11]  }
 0x14d   :  { %s619_s15 = sshll.u32 %s967_s14, 4  ;;  %s620_s15 = int_to_ptr.vmem [resolvable:$true] %s619_s15 }
 0x14e   :  { %s925_s5 = scalar_lea.vmem %s620_s15, 384  ;;  %p930_p13 = scmp.lt.s32.totalorder %s620_s15, %s620_s15 }
 0x14f   :  { %p926_p12 = scmp.ne.s32.totalorder %s620_s15, %s925_s5  ;;  %p931_p0 = scmp.lt.s32.totalorder %s925_s5, %s925_s5 }
 0x151   :  { %p932_p1 = por %p931_p0, %p930_p13 }
 0x153   :  { %p933_p2 = pnand %p932_p1, %p926_p12 }
 0x15f   :  { %v591_v12 = vpop.f32.mrb[4].mxu1  ;;  %v550_v14 = vpop.f32.mrb[4].mxu0 }
 0x160   :  { %v592_v13 = vadd.f32 %v591_v12, %v384_v9  ;;  %v738_v15 = vpop.f32.mrb[5].mxu1  ;;  %v551_v16 = vadd.f32 %v550_v14, %v376_v10  ;;  %v552_v17 = vpop.f32.mrb[5].mxu0 }
 0x161   :  { %v594_v18 = vpop.f32.mrb[6].mxu1  ;;  %v553_v19 = vadd.f32 %v552_v17, %v380_v11  ;;  %v554_v20 = vpop.f32.mrb[6].mxu0 }
 0x162   :  { %602 = vst [vmem:[#allocation11 + $0x10] sm:$0xff] %v592_v13  ;;  %v739_v21 = vpop.f32.mrb[7].mxu1  ;;  %600 = vst [vmem:[#allocation11] sm:$0xff] %v551_v16  ;;  %v555_v22 = vpop.f32.mrb[7].mxu0 }
 0x163   :  { %601 = vst [vmem:[#allocation11 + $0x8] sm:$0xff] %v553_v19 }
 0x164   :  { %936 = shalt.err (!%p933_p2)
}
 0x165   :  { %s937_s17 = scalar_lea.hbm %s1115_s7, 384 }
 0x166   :  { %p938_p3 = scmp.ne.s32.totalorder %s1115_s7, %s937_s17  ;;  %p941_p4 = scmp.lt.u32.totalorder %s937_s17, %s1115_s7 }
 0x168   :  { %p943_p5 = pnand %p941_p4, %p938_p3 }
 0x16a   :  { %946 = shalt.err (!%p943_p5)
}
 0x16b   :  { %622 = dma.vmem_to_hbm [thread:$0]  %s620_s15, 384, %s1115_s7, [#allocation12]  }
 0x16c   :  { %953 = dma.done.wait [#allocation4], 384  }
 0x16d   :  { %954 = vsyncadd [#allocation4], 4294966912 }
 0x16e   :  { %955 = dma.done.wait [#allocation12], 384  }
 0x16f   :  { %956 = vsyncadd [#allocation12], 4294966912 }
 0x170   :  { %629 = vsyncpa [#allocation3], 1 }
 0x171   :  { %630 = vsyncpa [#allocation6], 1 }
 0x172   :  { %631 = vsyncpa [#allocation9], 1 }
 0x173   :  { %632 = vsyncpa [#allocation4], 1 }
 0x174   :  { %633 = vsyncpa [#allocation12], 1 }

</bundles_post_ra>
